<compile_context>
chip_gen: v7x
topology: tpu7x:2x2x1
jax: 0.10.0
libtpu: 0.0.40
codegen_flags: <defaults>
</compile_context>

<pallas_src>
import jax
import jax.numpy as jnp
from jax.experimental import pallas as pl
from jax.experimental.pallas import tpu as pltpu


# ----------------------------- Pallas kernel --------------------------------
def kernelnet_kernel(x_ref, w1_ref, b1_ref, w2_ref, b2_ref, w3_ref, b3_ref,
                     o_ref):
    # Channel-major layout (positions on the lane axis):
    #   x_ref : [1, TN]            (TN = position tile, multiple of 128)
    #   w1    : [H, 1]   b1: [H, 1]
    #   w2    : [H, H]   b2: [H, 1]
    #   w3    : [O, H]   b3: [O, 1]
    #   o_ref : [O, TN]
    x = x_ref[...]                                            # [1, TN]

    # Layer 1: single input channel -> broadcast mul+add on the VPU
    # (avoids a degenerate K=1 pass through the MXU systolic array).
    h = jnp.maximum(w1_ref[...] * x + b1_ref[...], 0.0)       # [H, TN]

    # Layer 2: H x H matmul on the MXU, f32 accumulation.
    h = jnp.dot(w2_ref[...], h, preferred_element_type=jnp.float32)
    h = jnp.maximum(h + b2_ref[...], 0.0)                     # [H, TN]

    # Layer 3 (output linear, no activation).
    o = jnp.dot(w3_ref[...], h, preferred_element_type=jnp.float32)
    o_ref[...] = (o + b3_ref[...]).astype(o_ref.dtype)        # [O, TN]


def _round_up(n, m):
    return ((n + m - 1) // m) * m


def kernelnet_forward(x_ncl, params, *, tile_n=512):
    """x_ncl: [B, 1, L] float32 relative positions. Returns [B, out_ch, L]."""
    w1, b1, w2, b2, w3, b3 = params
    B, Cin, L = x_ncl.shape
    assert Cin == 1, "KernelNet takes a single relative-position channel"
    H = w2.shape[0]
    O = w3.shape[0]

    # Flatten positions; pad to a lane-aligned tile multiple.
    N = B * L
    tile_n = max(128, min(_round_up(tile_n, 128), _round_up(N, 128)))
    n_pad = _round_up(N, tile_n)

    # NCL (C=1) -> channel-major [1, N]: positions on the lane axis.
    x_flat = x_ncl.reshape(1, N)
    if n_pad != N:
        x_flat = jnp.pad(x_flat, ((0, 0), (0, n_pad - N)))

    grid = (n_pad // tile_n,)

    def resident(shape):
        # Tiny weight/bias blocks stay resident in VMEM across the whole grid.
        return pl.BlockSpec(shape, lambda i: (0, 0))

    out_flat = pl.pallas_call(
        kernelnet_kernel,
        out_shape=jax.ShapeDtypeStruct((O, n_pad), jnp.float32),
        grid=grid,
        in_specs=[
            pl.BlockSpec((1, tile_n), lambda i: (0, i)),   # x tile (lane-dense)
            resident((H, 1)), resident((H, 1)),            # w1, b1
            resident((H, H)), resident((H, 1)),            # w2, b2
            resident((O, H)), resident((O, 1)),            # w3, b3
        ],
        out_specs=pl.BlockSpec((O, tile_n), lambda i: (0, i)),
        compiler_params=pltpu.CompilerParams(
            dimension_semantics=("parallel",)),            # v7x dual-TC sharding
    )(x_flat, w1, b1.reshape(H, 1), w2, b2.reshape(H, 1), w3, b3.reshape(O, 1))

    # [O, B*L] -> [B, O, L]   (channel-major already; only a batch unfold left)
    out = out_flat[:, :N].reshape(O, B, L)
    return jnp.transpose(out, (1, 0, 2))


# ------------------------ deterministic initialization ----------------------
def kaiming_uniform(key, shape, fan_in, nonlinearity):
    # torch.nn.init.kaiming_uniform_(w, nonlinearity=...): bound = gain*sqrt(3/fan_in)
    gain = jnp.sqrt(2.0) if nonlinearity == "relu" else 1.0
    bound = gain * jnp.sqrt(3.0 / fan_in)
    return jax.random.uniform(key, shape, jnp.float32, -bound, bound)


def init_params(key, hidden_channels, out_channels):
    k1, k2, k3 = jax.random.split(key, 3)
    # Stored in torch Conv1d orientation [C_out, C_in] (kernel-size-1 squeezed),
    # which is exactly the channel-major layout the Pallas kernel consumes.
    w1 = kaiming_uniform(k1, (hidden_channels, 1), fan_in=1,
                         nonlinearity="relu")
    w2 = kaiming_uniform(k2, (hidden_channels, hidden_channels),
                         fan_in=hidden_channels, nonlinearity="relu")
    w3 = kaiming_uniform(k3, (out_channels, hidden_channels),
                         fan_in=hidden_channels, nonlinearity="linear")
    b1 = jnp.zeros((hidden_channels,), jnp.float32)
    b2 = jnp.zeros((hidden_channels,), jnp.float32)
    b3 = jnp.zeros((out_channels,), jnp.float32)
    return (w1, b1, w2, b2, w3, b3)


# ------------------------------- reference -----------------------------------
def kernelnet_reference(x_ncl, params):
    w1, b1, w2, b2, w3, b3 = params
    h = jnp.einsum("oi,bil->bol", w1, x_ncl) + b1[None, :, None]
    h = jnp.maximum(h, 0.0)
    h = jnp.einsum("oi,bil->bol", w2, h) + b2[None, :, None]
    h = jnp.maximum(h, 0.0)
    return jnp.einsum("oi,bil->bol", w3, h) + b3[None, :, None]


# --------------------------------- main --------------------------------------
if __name__ == "__main__":
    key = jax.random.PRNGKey(0)
    k_params, _ = jax.random.split(key)

    hidden_channels = 32   # config.hidden_channels
    out_channels = 4       # output_linear out features

    params = init_params(k_params, hidden_channels, out_channels)

    # Relative positions in [-1, 1], NCL layout: [batch=1, channels=1, L=300].
    # L=300 is not a multiple of 128, so the pad + 3-step grid path is exercised.
    B, L = 1, 300
    rel_pos = jnp.linspace(-1.0, 1.0, L, dtype=jnp.float32)
    x = jnp.broadcast_to(rel_pos.reshape(1, 1, L), (B, 1, L))

    # TODO(synk): CKConv evaluates one KernelNet per conv layer; for real models,
    # stack the per-layer weights and add a leading grid axis over that stack to
    # amortize launch overhead (single pallas_call), rather than one call each.
    out = kernelnet_forward(x, params, tile_n=128)
    out = jax.block_until_ready(out)

    ref = kernelnet_reference(x, params)
    assert out.shape == (B, out_channels, L), out.shape
    assert jnp.allclose(out, ref, atol=1e-5, rtol=1e-5), "mismatch vs reference"

    print("KERNEL_OK")
</pallas_src>

<mosaic_0001>
module attributes {stable_mosaic.version = 11 : i64} {
  func.func @kernelnet_kernel(%arg0: i32, %arg1: memref<1x128xf32, #tpu.memory_space<vmem>>, %arg2: memref<32x1xf32, #tpu.memory_space<vmem>>, %arg3: memref<32x1xf32, #tpu.memory_space<vmem>>, %arg4: memref<32x32xf32, #tpu.memory_space<vmem>>, %arg5: memref<32x1xf32, #tpu.memory_space<vmem>>, %arg6: memref<4x32xf32, #tpu.memory_space<vmem>>, %arg7: memref<4x1xf32, #tpu.memory_space<vmem>>, %arg8: memref<4x128xf32, #tpu.memory_space<vmem>>) attributes {dimension_semantics = [#tpu.dimension_semantics<parallel>], iteration_bounds = array<i64: 3>, scalar_prefetch = 0 : i64, scratch_operands = 0 : i64, tpu.core_type = #tpu.core_type<tc>, window_params = [{transform_indices = @transform_0, window_bounds = array<i64: 1, 128>}, {pipeline_mode = #tpu.pipeline_mode<synchronous>, transform_indices = @transform_1, window_bounds = array<i64: 32, 1>}, {pipeline_mode = #tpu.pipeline_mode<synchronous>, transform_indices = @transform_2, window_bounds = array<i64: 32, 1>}, {pipeline_mode = #tpu.pipeline_mode<synchronous>, transform_indices = @transform_3, window_bounds = array<i64: 32, 32>}, {pipeline_mode = #tpu.pipeline_mode<synchronous>, transform_indices = @transform_4, window_bounds = array<i64: 32, 1>}, {pipeline_mode = #tpu.pipeline_mode<synchronous>, transform_indices = @transform_5, window_bounds = array<i64: 4, 32>}, {pipeline_mode = #tpu.pipeline_mode<synchronous>, transform_indices = @transform_6, window_bounds = array<i64: 4, 1>}, {transform_indices = @transform_7, window_bounds = array<i64: 4, 128>}]} {
    %c0 = arith.constant 0 : index
    %c0_0 = arith.constant 0 : index
    %0 = vector.load %arg1[%c0, %c0_0] : memref<1x128xf32, #tpu.memory_space<vmem>>, vector<1x128xf32>
    %c0_1 = arith.constant 0 : index
    %c0_2 = arith.constant 0 : index
    %1 = vector.load %arg2[%c0_1, %c0_2] : memref<32x1xf32, #tpu.memory_space<vmem>>, vector<32x1xf32>
    %2 = vector.broadcast %1 : vector<32x1xf32> to vector<32x128xf32>
    %3 = vector.broadcast %0 : vector<1x128xf32> to vector<32x128xf32>
    %4 = arith.mulf %2, %3 : vector<32x128xf32>
    %c0_3 = arith.constant 0 : index
    %c0_4 = arith.constant 0 : index
    %5 = vector.load %arg3[%c0_3, %c0_4] : memref<32x1xf32, #tpu.memory_space<vmem>>, vector<32x1xf32>
    %6 = vector.broadcast %5 : vector<32x1xf32> to vector<32x128xf32>
    %7 = arith.addf %4, %6 : vector<32x128xf32>
    %cst = arith.constant 0.000000e+00 : f32
    %8 = vector.broadcast %cst : f32 to vector<32x128xf32>
    %9 = arith.maximumf %7, %8 : vector<32x128xf32>
    %c0_5 = arith.constant 0 : index
    %c0_6 = arith.constant 0 : index
    %10 = vector.load %arg4[%c0_5, %c0_6] : memref<32x32xf32, #tpu.memory_space<vmem>>, vector<32x32xf32>
    %cst_7 = arith.constant dense<0.000000e+00> : vector<32x128xf32>
    %11 = tpu.matmul %10, %9, %cst_7 {dimension_numbers = #tpu.dot_dimension_numbers<[1], [0], [0], [1], [0, 0, 1, 1], [], []>} : vector<32x32xf32>, vector<32x128xf32>, vector<32x128xf32> -> vector<32x128xf32>
    %c0_8 = arith.constant 0 : index
    %c0_9 = arith.constant 0 : index
    %12 = vector.load %arg5[%c0_8, %c0_9] : memref<32x1xf32, #tpu.memory_space<vmem>>, vector<32x1xf32>
    %13 = vector.broadcast %12 : vector<32x1xf32> to vector<32x128xf32>
    %14 = arith.addf %11, %13 : vector<32x128xf32>
    %cst_10 = arith.constant 0.000000e+00 : f32
    %15 = vector.broadcast %cst_10 : f32 to vector<32x128xf32>
    %16 = arith.maximumf %14, %15 : vector<32x128xf32>
    %c0_11 = arith.constant 0 : index
    %c0_12 = arith.constant 0 : index
    %17 = vector.load %arg6[%c0_11, %c0_12] : memref<4x32xf32, #tpu.memory_space<vmem>>, vector<4x32xf32>
    %cst_13 = arith.constant dense<0.000000e+00> : vector<4x128xf32>
    %18 = tpu.matmul %17, %16, %cst_13 {dimension_numbers = #tpu.dot_dimension_numbers<[1], [0], [0], [1], [0, 0, 1, 1], [], []>} : vector<4x32xf32>, vector<32x128xf32>, vector<4x128xf32> -> vector<4x128xf32>
    %c0_14 = arith.constant 0 : index
    %c0_15 = arith.constant 0 : index
    %19 = vector.load %arg7[%c0_14, %c0_15] : memref<4x1xf32, #tpu.memory_space<vmem>>, vector<4x1xf32>
    %20 = vector.broadcast %19 : vector<4x1xf32> to vector<4x128xf32>
    %21 = arith.addf %18, %20 : vector<4x128xf32>
    %c0_16 = arith.constant 0 : index
    %c0_17 = arith.constant 0 : index
    %22 = vector.load %arg8[%c0_16, %c0_17] : memref<4x128xf32, #tpu.memory_space<vmem>>, vector<4x128xf32>
    tpu.vector_store %arg8[%c0_16, %c0_17], %21 {strides = array<i32>} : memref<4x128xf32, #tpu.memory_space<vmem>>, vector<4x128xf32>,
    return
  }
  func.func @transform_0(%arg0: i32) -> (i32, i32) {
    %c0_i32 = arith.constant 0 : i32
    %c0_i32_0 = arith.constant 0 : i32
    return %c0_i32, %arg0 : i32, i32
  }
  func.func @transform_1(%arg0: i32) -> (i32, i32) {
    %c0_i32 = arith.constant 0 : i32
    %c0_i32_0 = arith.constant 0 : i32
    %c0_i32_1 = arith.constant 0 : i32
    return %c0_i32, %c0_i32_0 : i32, i32
  }
  func.func @transform_2(%arg0: i32) -> (i32, i32) {
    %c0_i32 = arith.constant 0 : i32
    %c0_i32_0 = arith.constant 0 : i32
    %c0_i32_1 = arith.constant 0 : i32
    return %c0_i32, %c0_i32_0 : i32, i32
  }
  func.func @transform_3(%arg0: i32) -> (i32, i32) {
    %c0_i32 = arith.constant 0 : i32
    %c0_i32_0 = arith.constant 0 : i32
    %c0_i32_1 = arith.constant 0 : i32
    return %c0_i32, %c0_i32_0 : i32, i32
  }
  func.func @transform_4(%arg0: i32) -> (i32, i32) {
    %c0_i32 = arith.constant 0 : i32
    %c0_i32_0 = arith.constant 0 : i32
    %c0_i32_1 = arith.constant 0 : i32
    return %c0_i32, %c0_i32_0 : i32, i32
  }
  func.func @transform_5(%arg0: i32) -> (i32, i32) {
    %c0_i32 = arith.constant 0 : i32
    %c0_i32_0 = arith.constant 0 : i32
    %c0_i32_1 = arith.constant 0 : i32
    return %c0_i32, %c0_i32_0 : i32, i32
  }
  func.func @transform_6(%arg0: i32) -> (i32, i32) {
    %c0_i32 = arith.constant 0 : i32
    %c0_i32_0 = arith.constant 0 : i32
    %c0_i32_1 = arith.constant 0 : i32
    return %c0_i32, %c0_i32_0 : i32, i32
  }
  func.func @transform_7(%arg0: i32) -> (i32, i32) {
    %c0_i32 = arith.constant 0 : i32
    %c0_i32_0 = arith.constant 0 : i32
    return %c0_i32, %arg0 : i32, i32
  }
}

</mosaic_0001>

<bundles_post_ra>
// kernel: tpu_custom_call.1
= control target key start
LH: loop header
LB: loop body
LE: loop exit
PB: predicated region body
PF: predicated region fallthrough
CT: control target
= control target key end

     0   :  { %12 = vsyncpa [#allocation3], 0  ;;  %s999_s0 = inlined_call_operand.vmem [shape: f32[1,384], index: 0, kind: input, shape index: {}]   ;;  %s1000_s1 = inlined_call_operand.vmem [shape: f32[32,1], index: 1, kind: input, shape index: {}]   ;;  %s1001_s2 = inlined_call_operand.vmem [shape: f32[32,1], index: 2, kind: input, shape index: {}]   ;;  %s1002_s3 = inlined_call_operand.vmem [shape: f32[32,32], index: 3, kind: input, shape index: {}]   ;;  %s1003_s4 = inlined_call_operand.vmem [shape: f32[32,1], index: 4, kind: input, shape index: {}]   ;;  %s1004_s5 = inlined_call_operand.vmem [shape: f32[4,32], index: 5, kind: input, shape index: {}]   ;;  %s1005_s6 = inlined_call_operand.vmem [shape: f32[4,1], index: 6, kind: input, shape index: {}]   ;;  %s1006_s7 = inlined_call_operand.hbm [shape: f32[4,384], index: 7, kind: output, shape index: {}]  }
   0x1   :  { %14 = vsyncpa [#allocation3 + $0x1], 0  ;;  %s840_s24 = smov 0   ;;  %s842_s25 = smov 0  }
   0x2   :  { %s844_s26 = smov 0   ;;  %s846_s27 = smov 0  }
   0x3 LB: > { %s861_s28 = sadd.s32 4294967295, %s793_s27   ;;  %s619_s29 = sadd.s32 4294967294, %s793_s27   ;;  %s793_s27 = sphi %s846_s27, %s1012_s27   ;;  %s789_s26 = sphi %s844_s26, %s1011_s26   ;;  %s785_s25 = sphi %s842_s25, %s1010_s25   ;;  %s781_s24 = sphi %s840_s24, %s1009_s24  }
   0x4   : > { %s865_s30 = sadd.s32 1, %s793_s27   ;;  %s179_s8 = sadd.s32 1, %s789_s26 }
   0x5   : > { %s176_s9 = ssub.s32 %s793_s27, %s865_s30  ;;  %p189_p0 = scmp.ne.s32.totalorder %s789_s26, %s785_s25 }
   0x6   : > { %p177_p1 = scmp.eq.s32.totalorder %s176_s9, 0  ;;  %p190_p2 = scmp.eq.s32.totalorder %s861_s28, 2 }
   0x7   : > { %p195_p3 = scmp.ne.s32.totalorder %s785_s25, %s781_s24  ;;  %p196_p4 = scmp.eq.s32.totalorder %s619_s29, 2 }
   0x8   : > { %s876_s10 = scalar_select %p177_p1, %s789_s26, %s179_s8  }
   0x9   : > { %p878_p5 = por %p190_p2, %p189_p0  ;;  %p882_p6 = por %p196_p4, %p195_p3 }
   0xa   : > { %p622_p7 = scmp.ge.s32.totalorder %s793_s27, 1  ;;  %p238_p8 = scmp.lt.s32.totalorder %s793_s27, 4 }
   0xc   : > { %p239_p9 = pnand %p622_p7, %p238_p8 }
   0xd   : > { %v306_v0 = vld [vmem:[%s1001_s2] sm:$0xff] (!%p239_p9)  ;;  %v795_v2 = vmov (!%p239_p9), 0   ;;  %v307_v3 = vld [vmem:[%s1001_s2 + $0x8] sm:$0xff] (!%p239_p9)  ;;  %v275_v5 = vld [vmem:[%s1000_s1 + $0x18] sm:$0xff] (!%p239_p9)  ;;  %vm366_vm0 = vcmask (!%p239_p9), 261120   ;;  %p268_p10 = scmp.lt.s32.totalorder (!%p239_p9), %s861_s28, 2 }
   0xe   : > { %242 = sbr.rel (%p239_p9) target bundleno = 619 (0x26b), region = 48  ;;  %v272_v1 = vld [vmem:[%s1000_s1] sm:$0xff] (!%p239_p9)  ;;  %730 = vset.pattern.permute.xlu1 (!%p239_p9), %v795_v2  ;;  %729 = vset.pattern.permute.xlu0 (!%p239_p9), %v795_v2  ;;  %v273_v4 = vld [vmem:[%s1000_s1 + $0x8] sm:$0xff] (!%p239_p9)  ;;  %v274_v6 = vld [vmem:[%s1000_s1 + $0x10] sm:$0xff] (!%p239_p9)  ;;  %v796_v41 = vmov (!%p239_p9), 0.0|0.0   ;;  %vm797_vm1 = vmmov (!%p239_p9), 0  }
   0xf   : > { %312 = vperm.xlu1 (!%p239_p9), %730, %v306_v0   ;;  %278 = vperm.xlu0 (!%p239_p9), %729, %v272_v1   ;;  %v309_v7 = vld [vmem:[%s1001_s2 + $0x18] sm:$0xff] (!%p239_p9)  ;;  %v308_v8 = vld [vmem:[%s1001_s2 + $0x10] sm:$0xff] (!%p239_p9)  ;;  %v343_v9 = vld [vmem:[%s1003_s4 + $0x8] sm:$0xff] (!%p239_p9)  ;;  %v798_v42 = vmov (!%p239_p9), 0.0   ;;  %s265_s8 = sand.u32 (!%p239_p9), 1, %s785_s25  }
  0x10   : > { %v342_v10 = vld [vmem:[%s1003_s4] sm:$0xff] (!%p239_p9)  ;;  %v345_v11 = vld [vmem:[%s1003_s4 + $0x18] sm:$0xff] (!%p239_p9)  ;;  %v344_v12 = vld [vmem:[%s1003_s4 + $0x10] sm:$0xff] (!%p239_p9)  ;;  %680 = vmatprep.subr.bf16.mxu1 (!%p239_p9), %v796_v41  ;;  %669 = vmatprep.mubr.msk.f32.mxu1 (!%p239_p9), %vm797_vm1, %v798_v42  ;;  %s623_s9 = sshll.u32 (!%p239_p9), %s265_s8, 2  ;;  %s550_s19 = scalar_lea.sflag (!%p239_p9), [#allocation3], %s265_s8 }
  0x11   : > { %v338_v13 = vld [vmem:[%s1002_s3] sm:$0xff] (!%p239_p9)  ;;  %v339_v38 = vld [vmem:[%s1002_s3 + $0x8] sm:$0xff] (!%p239_p9)  ;;  %v340_v39 = vld [vmem:[%s1002_s3 + $0x10] sm:$0xff] (!%p239_p9)  ;;  %s267_s14 = scalar_lea.vmem (!%p239_p9), [#allocation2], %s623_s9 }
  0x12   : > { %v469_v14 = vld [vmem:[%s1005_s6] sm:$0xf] (!%p239_p9)  ;;  %655 = vmatprep.mubr.msk.f32.mxu0 (!%p239_p9), %vm366_vm0, %v338_v13  ;;  %v341_v40 = vld [vmem:[%s1002_s3 + $0x18] sm:$0xff] (!%p239_p9)  ;;  %s563_s15 = sshll.u32 (!%p239_p9), %s267_s14, 4  ;;  %s959_s15 = int_to_ptr.vmem [resolvable:$true] %s563_s15 }
  0x13   : > { %317 = vperm.xlu1 (!%p239_p9), %730, %v307_v3   ;;  %283 = vperm.xlu0 (!%p239_p9), %729, %v273_v4   ;;  %v468_v61 = vld [vmem:[%s1004_s5] sm:$0xf] (!%p239_p9)  ;;  %s731_s20 = scalar_lea.vmem (!%p239_p9), %s959_s15, 64 }
  0x14   : > { %p732_p11 = scmp.ne.s32.totalorder (!%p239_p9), %s959_s15, %s731_s20 }
  0x15   : > { %s269_s13 = scalar_select %p268_p10, %s861_s28, 2 }
  0x16   : > { %p733_p12 = pnand %p732_p11, %p878_p5 }
  0x17   : > { %293 = vperm.xlu1 %730, %v275_v5   ;;  %288 = vperm.xlu0 %729, %v274_v6   ;;  %s270_s16 = scalar_lea.vmem %s999_s0, %s269_s13  ;;  %s631_s13 = sshll.u32 %s861_s28, 6 }
  0x18   : > { %v624_v15 = vld [vmem:[%s270_s16] ss:$0 sm:$0xff]  ;;  %s957_s18 = scalar_lea.hbm %s1006_s7, %s631_s13  ;;  %p734_p13 = pneg %p733_p12 }
  0x19   : > { %s799_s28 = smov [#allocation2]  }
  0x1a   : > { %s735_s21 = sshll.u32 %s799_s28, 4  ;;  %s736_s21 = int_to_ptr.vmem [resolvable:$false] %s735_s21 }
  0x1b   : > { %327 = vperm.xlu1 %730, %v309_v7   ;;  %322 = vperm.xlu0 %729, %v308_v8   ;;  %s737_s22 = scalar_lea.vmem %s736_s21, 128  ;;  %p738_p0 = scmp.lt.s32.totalorder %s959_s15, %s736_s21 }
  0x1c   : > { %p739_p1 = scmp.lt.s32.totalorder %s737_s22, %s731_s20 }
  0x1e   : > { %p740_p2 = por %p739_p1, %p738_p0 }
  0x1f   : > { %353 = vperm.xlu1 %730, %v343_v9   ;;  %348 = vperm.xlu0 %729, %v342_v10  }
  0x20   : > { %p741_p3 = pnand %p740_p2, %p734_p13 }
  0x23   : > { %363 = vperm.xlu1 %730, %v345_v11   ;;  %358 = vperm.xlu0 %729, %v344_v12  }
  0x27   : > { %472 = vperm.xlu0 %729, %v469_v14  }
  0x8e   : > { %v313_v16 = vpop.permute.xlu1 %312  ;;  %v279_v17 = vpop.permute.xlu0 %278 }
  0x8f   : > { %v302_v18 = vmul.f32 %v624_v15, %v279_v17 }
  0x91   : > { %v330_v21 = vadd.f32 %v313_v16, %v302_v18 }
  0x92   : > { %v318_v19 = vpop.permute.xlu1 %317  ;;  %v284_v20 = vpop.permute.xlu0 %283 }
  0x93   : > { %v303_v22 = vmul.f32 %v624_v15, %v284_v20  ;;  %v334_v26 = vmax.f32 %v330_v21, 0.0 }
  0x95   : > { %v331_v23 = vadd.f32 %v318_v19, %v303_v22 }
  0x96   : > { %v294_v24 = vpop.permute.xlu1 %293  ;;  %v289_v25 = vpop.permute.xlu0 %288 }
  0x97   : > { %v335_v27 = vmax.f32 %v331_v23, 0.0  ;;  %v305_v28 = vmul.f32 %v624_v15, %v294_v24  ;;  %v304_v29 = vmul.f32 %v624_v15, %v289_v25 }
  0x99   : > { %v672_v30 = vpack.c.bf16 %v335_v27, %v334_v26 }
  0x9a   : > { %v328_v31 = vpop.permute.xlu1 %327  ;;  %v323_v32 = vpop.permute.xlu0 %322 }
  0x9b   : > { %v333_v33 = vadd.f32 %v328_v31, %v305_v28  ;;  %v332_v34 = vadd.f32 %v323_v32, %v304_v29  ;;  %673 = vmatprep.subr.bf16.mxu0 %v672_v30 }
  0x9c   : > { %675 = vmatpush3.bf16.msra.mxu0 %v672_v30 }
  0x9d   : > { %v337_v35 = vmax.f32 %v333_v33, 0.0  ;;  %v336_v36 = vmax.f32 %v332_v34, 0.0 }
  0x9e   : > { %v354_v43 = vpop.permute.xlu1 %353  ;;  %v349_v44 = vpop.permute.xlu0 %348 }
  0x9f   : > { %v676_v37 = vpack.c.bf16 %v337_v35, %v336_v36 }
  0xa1   : > { %677 = vmatprep.subr.bf16.mxu0 %v676_v37 }
  0xa2   : > { %679 = vmatpush3.bf16.msra.mxu0 %v676_v37  ;;  %v364_v50 = vpop.permute.xlu1 %363  ;;  %v359_v53 = vpop.permute.xlu0 %358 }
  0xa5   : > { %656 = vmatmul.mubr.msk.f32.vlgmr.msra.gmra.mrb[0].mxu0 %vm366_vm0, %v339_v38 }
  0xa6   : > { %658 = vmatprep.mubr.msk.f32.mxu0 %vm366_vm0, %v340_v39  ;;  %v473_v62 = vpop.permute.xlu0 %472 }
  0xa9   : > { %659 = vmatmul.mubr.msk.f32.gmra.mrb[2].mxu0 %vm366_vm0, %v341_v40 }
 0x178   : > { %v657_v45 = vpop.f32.mrb[0].mxu0 }
 0x179   : > { %v451_v46 = vadd.f32 %v657_v45, %v354_v43  ;;  %v445_v47 = vpop.f32.mrb[1].mxu0 }
 0x17a   : > { %v446_v48 = vadd.f32 %v445_v47, %v349_v44 }
 0x17b   : > { %v465_v49 = vmax.f32 %v451_v46, 0.0 }
 0x17c   : > { %v464_v51 = vmax.f32 %v446_v48, 0.0  ;;  %v660_v52 = vpop.f32.mrb[2].mxu0 }
 0x17d   : > { %v461_v54 = vadd.f32 %v660_v52, %v364_v50  ;;  %v455_v55 = vpop.f32.mrb[3].mxu0 }
 0x17e   : > { %v456_v56 = vadd.f32 %v455_v55, %v359_v53  ;;  %v681_v57 = vpack.c.bf16 %v465_v49, %v464_v51 }
 0x17f   : > { %v467_v58 = vmax.f32 %v461_v54, 0.0 }
 0x180   : > { %v466_v59 = vmax.f32 %v456_v56, 0.0  ;;  %682 = vmatpush3.bf16.msra.mxu1 %v681_v57 }
 0x181   : > { %683 = vmatprep.subr.bf16.mxu1 %v796_v41 }
 0x182   : > { %v684_v60 = vpack.c.bf16 %v467_v58, %v466_v59 }
 0x184   : > { %685 = vmatpush3.bf16.msra.mxu1 %v684_v60 }
 0x187   : > { %670 = vmatmul.mubr.msk.f32.vlgmr.msra.gmra.mrb[0].mxu1 %vm366_vm0, %v468_v61 }
 0x25a   : > { %v544_v63 = vpop.f32.mrb[0].mxu1 }
 0x25b   : > { %v545_v0 = vadd.f32 %v544_v63, %v473_v62  ;;  %v671_v1 = vpop.f32.mrb[1].mxu1 }
 0x25d   : > { %548 = vst [vmem:[%s267_s14] sm:$0xf] %v545_v0 }
 0x25e   : > { %744 = shalt.err (!%p741_p3)
}
 0x25f   : > { %s745_s23 = scalar_lea.hbm %s957_s18, 64  ;;  %s749_s9 = scalar_lea.hbm %s1006_s7, 192 }
 0x260   : > { %p746_p4 = scmp.ne.s32.totalorder %s957_s18, %s745_s23  ;;  %p750_p9 = scmp.lt.u32.totalorder %s957_s18, %s1006_s7 }
 0x261   : > { %p751_p10 = scmp.lt.u32.totalorder %s749_s9, %s745_s23  ;;  %p753_p12 = scmp.lt.u32.totalorder %s745_s23, %s957_s18 }
 0x262   : > { %p747_p7 = pnand %p746_p4, %p878_p5 }
 0x263   : > { %p752_p11 = por %p751_p10, %p750_p9 }
 0x264   : > { %p748_p8 = pneg %p747_p7 }
 0x265   : > { %p754_p13 = por %p753_p12, %p752_p11 }
 0x267   : > { %p755_p0 = pnand %p754_p13, %p748_p8 }
 0x269   : > { %758 = shalt.err (!%p755_p0)
}
 0x26a   : > { %686 = dma.vmem_to_hbm [thread:$0]  (%p878_p5), %s959_s15, 64, %s957_s18, %s550_s19  }
 0x26b PF: > { %p692_p1 = scmp.ge.s32.totalorder %s793_s27, 2  ;;  %s575_s16 = sand.u32 1, %s781_s24  }
 0x26c   : > { %s576_s17 = scalar_lea.sflag [#allocation3], %s575_s16 }
 0x26d   : > { %p689_p2 = pnand %p692_p1, %p882_p6 }
 0x26f   : > { %776 = dma.done.wait (!%p689_p2), %s576_s17, 64  }
 0x270   : > { %778 = vsyncadd (!%p689_p2), %s576_s17, 4294967232  ;;  %p17_p3 = scmp.ge.s32.totalorder %s865_s30, 5   ;;  %s1009_s24 = smov %s785_s25 }
 0x271   : > { %s1010_s25 = smov %s789_s26  ;;  %s1011_s26 = smov %s876_s10 }
 0x272   : > { %s1012_s27 = smov %s865_s30  ;;  %19 = sbr.rel (!%p17_p3) target bundleno = 3 (0x3), region = 83 }
 0x279   :  { %581 = vsyncpa [#allocation3], 1 }
 0x27a   :  { %583 = vsyncpa [#allocation3 + $0x1], 1 }

</bundles_post_ra>
